<compile_context>
chip_gen: v5e
topology: v5e:2x2
jax: 0.10.0
libtpu: 0.0.40
codegen_flags: <defaults>
</compile_context>

<pallas_src>
import functools

import jax
import jax.numpy as jnp
from jax.experimental import pallas as pl
from jax.experimental.pallas import tpu as pltpu

EPS = 1e-5


def _stats_kernel(x_ref, sum_ref, sq_ref, *, hw, hw_tile, need_mask):
    # x_ref: (C, hw_tile) block of the (N, C, HW) view (N squeezed).
    n_i = pl.program_id(0)
    h_i = pl.program_id(1)

    @pl.when(jnp.logical_and(n_i == 0, h_i == 0))
    def _():
        sum_ref[...] = jnp.zeros_like(sum_ref)
        sq_ref[...] = jnp.zeros_like(sq_ref)

    x = x_ref[...].astype(jnp.float32)
    if need_mask:  # static: only emitted when HW % hw_tile != 0
        lane = jax.lax.broadcasted_iota(jnp.int32, x.shape, 1)
        x = jnp.where(h_i * hw_tile + lane < hw, x, 0.0)

    sum_ref[...] += jnp.sum(x, axis=1, keepdims=True)
    sq_ref[...] += jnp.sum(x * x, axis=1, keepdims=True)


def _apply_kernel(x_ref, scale_ref, bias_ref, o_ref):
    # x_ref / o_ref: (C, hw_tile); scale/bias: (C, 1) broadcast over lanes.
    x = x_ref[...].astype(jnp.float32)
    y = x * scale_ref[...] + bias_ref[...]
    o_ref[...] = jnp.maximum(y, 0.0).astype(o_ref.dtype)


def _pick_hw_tile(c, hw):
    """Lane-dense tile: multiple of 128, ~<=2 MiB per (C, tile) f32 buffer."""
    budget_lanes = (2 << 20) // (4 * max(c, 1))
    tile = max(128, (budget_lanes // 128) * 128)
    if hw <= tile:
        return hw  # full extent is always a legal block dim
    return tile


def batchnorm_relu(x_nchw, gamma, beta):
    """x_nchw: (N, C, H, W). gamma, beta: (C,). Returns (N, C, H, W)."""
    n, c, h, w = x_nchw.shape
    hw = h * w
    x3 = x_nchw.reshape(n, c, hw)  # free view; no HBM round-trip

    hw_tile = _pick_hw_tile(c, hw)
    num_hw = pl.cdiv(hw, hw_tile)
    need_mask = (hw % hw_tile) != 0

    # ---------------- pass 1: per-channel sum / sum-of-squares ----------------
    csum, csq = pl.pallas_call(
        functools.partial(
            _stats_kernel, hw=hw, hw_tile=hw_tile, need_mask=need_mask
        ),
        out_shape=(
            jax.ShapeDtypeStruct((c, 1), jnp.float32),
            jax.ShapeDtypeStruct((c, 1), jnp.float32),
        ),
        grid_spec=pltpu.PrefetchScalarGridSpec(
            num_scalar_prefetch=0,
            grid=(n, num_hw),
            in_specs=[
                pl.BlockSpec((None, c, hw_tile), lambda ni, hi: (ni, 0, hi)),
            ],
            out_specs=(
                pl.BlockSpec((c, 1), lambda ni, hi: (0, 0)),
                pl.BlockSpec((c, 1), lambda ni, hi: (0, 0)),
            ),
        ),
        compiler_params=pltpu.CompilerParams(
            dimension_semantics=("arbitrary", "arbitrary")
        ),
    )(x3)

    # ---- fold stats + affine into per-channel scale/bias (tiny (C,1) math) ----
    cnt = jnp.float32(n * hw)
    mean = csum / cnt
    var = jnp.maximum(csq / cnt - mean * mean, 0.0)  # biased variance (training BN)
    inv_std = jax.lax.rsqrt(var + EPS)
    scale = gamma.reshape(c, 1).astype(jnp.float32) * inv_std
    bias = beta.reshape(c, 1).astype(jnp.float32) - mean * scale

    # ---------------- pass 2: y = max(x * scale + bias, 0) --------------------
    out3 = pl.pallas_call(
        _apply_kernel,
        out_shape=jax.ShapeDtypeStruct((n, c, hw), x_nchw.dtype),
        grid_spec=pltpu.PrefetchScalarGridSpec(
            num_scalar_prefetch=0,
            grid=(n, num_hw),
            in_specs=[
                pl.BlockSpec((None, c, hw_tile), lambda ni, hi: (ni, 0, hi)),
                pl.BlockSpec((c, 1), lambda ni, hi: (0, 0)),
                pl.BlockSpec((c, 1), lambda ni, hi: (0, 0)),
            ],
            out_specs=pl.BlockSpec((None, c, hw_tile), lambda ni, hi: (ni, 0, hi)),
        ),
        compiler_params=pltpu.CompilerParams(
            dimension_semantics=("parallel", "parallel")
        ),
    )(x3, scale, bias)

    return out3.reshape(n, c, h, w)


if __name__ == "__main__":
    key = jax.random.PRNGKey(0)
    N, C, H, W = 2, 4, 16, 16
    x = jax.random.normal(key, (N, C, H, W), dtype=jnp.float32)

    # nn.BatchNorm2d init: weight (gamma) = 1, bias (beta) = 0
    gamma = jnp.ones((C,), dtype=jnp.float32)
    beta = jnp.zeros((C,), dtype=jnp.float32)

    out = batchnorm_relu(x, gamma, beta)
    out = jax.block_until_ready(out)

    # reference: training-mode BN (batch stats, biased var, eps=1e-5) + ReLU
    mean = jnp.mean(x, axis=(0, 2, 3), keepdims=True)
    var = jnp.var(x, axis=(0, 2, 3), keepdims=True)
    ref = jnp.maximum((x - mean) / jnp.sqrt(var + EPS), 0.0)

    assert out.shape == (N, C, H, W)
    assert jnp.max(jnp.abs(out - ref)) < 1e-4

    print("KERNEL_OK")
</pallas_src>

<mosaic_0001>
module attributes {stable_mosaic.version = 11 : i64} {
  func.func @_stats_kernel(%arg0: i32, %arg1: i32, %arg2: memref<1x4x256xf32, #tpu.memory_space<vmem>>, %arg3: memref<4x1xf32, #tpu.memory_space<vmem>>, %arg4: memref<4x1xf32, #tpu.memory_space<vmem>>) attributes {dimension_semantics = [#tpu.dimension_semantics<arbitrary>, #tpu.dimension_semantics<arbitrary>], iteration_bounds = array<i64: 2, 1>, scalar_prefetch = 0 : i64, scratch_operands = 0 : i64, tpu.core_type = #tpu.core_type<tc>, window_params = [{transform_indices = @transform_0, window_bounds = array<i64: 1, 4, 256>}, {pipeline_mode = #tpu.pipeline_mode<synchronous>, transform_indices = @transform_1, window_bounds = array<i64: 4, 1>}, {pipeline_mode = #tpu.pipeline_mode<synchronous>, transform_indices = @transform_2, window_bounds = array<i64: 4, 1>}]} {
    %c0_i32 = arith.constant 0 : i32
    %0 = arith.cmpi eq, %arg0, %c0_i32 : i32
    %c0_i32_0 = arith.constant 0 : i32
    %1 = arith.cmpi eq, %arg1, %c0_i32_0 : i32
    %2 = arith.andi %0, %1 : i1
    %3 = arith.extui %2 : i1 to i32
    %c0_i32_1 = arith.constant 0 : i32
    %4 = arith.cmpi ne, %3, %c0_i32_1 : i32
    scf.if %4 {
      %cst_13 = arith.constant 0.000000e+00 : f32
      %18 = vector.broadcast %cst_13 : f32 to vector<4x1xf32>
      %c0_14 = arith.constant 0 : index
      %c0_15 = arith.constant 0 : index
      %19 = vector.load %arg3[%c0_14, %c0_15] : memref<4x1xf32, #tpu.memory_space<vmem>>, vector<4x1xf32>
      tpu.vector_store %arg3[%c0_14, %c0_15], %18 {strides = array<i32>} : memref<4x1xf32, #tpu.memory_space<vmem>>, vector<4x1xf32>,
      %cst_16 = arith.constant 0.000000e+00 : f32
      %20 = vector.broadcast %cst_16 : f32 to vector<4x1xf32>
      %c0_17 = arith.constant 0 : index
      %c0_18 = arith.constant 0 : index
      %21 = vector.load %arg4[%c0_17, %c0_18] : memref<4x1xf32, #tpu.memory_space<vmem>>, vector<4x1xf32>
      tpu.vector_store %arg4[%c0_17, %c0_18], %20 {strides = array<i32>} : memref<4x1xf32, #tpu.memory_space<vmem>>, vector<4x1xf32>,
    } else {
    }
    %c0 = arith.constant 0 : index
    %c0_2 = arith.constant 0 : index
    %c0_3 = arith.constant 0 : index
    %5 = vector.load %arg2[%c0, %c0_2, %c0_3] : memref<1x4x256xf32, #tpu.memory_space<vmem>>, vector<1x4x256xf32>
    %6 = vector.shape_cast %5 : vector<1x4x256xf32> to vector<4x256xf32>
    %c0_4 = arith.constant 0 : index
    %c0_5 = arith.constant 0 : index
    %7 = vector.load %arg3[%c0_4, %c0_5] : memref<4x1xf32, #tpu.memory_space<vmem>>, vector<4x1xf32>
    %cst = arith.constant dense<0.000000e+00> : vector<4xf32>
    %8 = vector.multi_reduction <add>, %6, %cst [1] : vector<4x256xf32> to vector<4xf32>
    %9 = vector.shape_cast %8 : vector<4xf32> to vector<4x1xf32>
    %10 = arith.addf %7, %9 : vector<4x1xf32>
    %c0_6 = arith.constant 0 : index
    %c0_7 = arith.constant 0 : index
    %11 = vector.load %arg3[%c0_6, %c0_7] : memref<4x1xf32, #tpu.memory_space<vmem>>, vector<4x1xf32>
    tpu.vector_store %arg3[%c0_6, %c0_7], %10 {strides = array<i32>} : memref<4x1xf32, #tpu.memory_space<vmem>>, vector<4x1xf32>,
    %c0_8 = arith.constant 0 : index
    %c0_9 = arith.constant 0 : index
    %12 = vector.load %arg4[%c0_8, %c0_9] : memref<4x1xf32, #tpu.memory_space<vmem>>, vector<4x1xf32>
    %13 = arith.mulf %6, %6 : vector<4x256xf32>
    %cst_10 = arith.constant dense<0.000000e+00> : vector<4xf32>
    %14 = vector.multi_reduction <add>, %13, %cst_10 [1] : vector<4x256xf32> to vector<4xf32>
    %15 = vector.shape_cast %14 : vector<4xf32> to vector<4x1xf32>
    %16 = arith.addf %12, %15 : vector<4x1xf32>
    %c0_11 = arith.constant 0 : index
    %c0_12 = arith.constant 0 : index
    %17 = vector.load %arg4[%c0_11, %c0_12] : memref<4x1xf32, #tpu.memory_space<vmem>>, vector<4x1xf32>
    tpu.vector_store %arg4[%c0_11, %c0_12], %16 {strides = array<i32>} : memref<4x1xf32, #tpu.memory_space<vmem>>, vector<4x1xf32>,
    return
  }
  func.func @transform_0(%arg0: i32, %arg1: i32) -> (i32, i32, i32) {
    %c0_i32 = arith.constant 0 : i32
    %c0_i32_0 = arith.constant 0 : i32
    return %arg0, %c0_i32, %arg1 : i32, i32, i32
  }
  func.func @transform_1(%arg0: i32, %arg1: i32) -> (i32, i32) {
    %c0_i32 = arith.constant 0 : i32
    %c0_i32_0 = arith.constant 0 : i32
    %c0_i32_1 = arith.constant 0 : i32
    return %c0_i32, %c0_i32_0 : i32, i32
  }
  func.func @transform_2(%arg0: i32, %arg1: i32) -> (i32, i32) {
    %c0_i32 = arith.constant 0 : i32
    %c0_i32_0 = arith.constant 0 : i32
    %c0_i32_1 = arith.constant 0 : i32
    return %c0_i32, %c0_i32_0 : i32, i32
  }
}

</mosaic_0001>

<bundles_post_ra>
// kernel: tpu_custom_call.1
= control target key start
LH: loop header
LB: loop body
LE: loop exit
PB: predicated region body
PF: predicated region fallthrough
CT: control target
= control target key end

     0   :  { %8 = vsyncpa [#allocation3], 0  ;;  %s531_s0 = inlined_call_operand.hbm [shape: f32[2,4,256], index: 0, kind: input, shape index: {}]   ;;  %s532_s1 = inlined_call_operand.vmem [shape: f32[4,1], index: 1, kind: output, shape index: {0}]   ;;  %s533_s2 = inlined_call_operand.vmem [shape: f32[4,1], index: 2, kind: output, shape index: {1}]  }
   0x1   :  { %10 = vsyncpa [#allocation3 + $0x1], 0  ;;  %s429_s9 = smov 0   ;;  %s431_s10 = smov 0  }
   0x2   :  { %s433_s11 = smov 0   ;;  %s435_s12 = smov 0  }
   0x3   :  { %s437_s13 = smov 0   ;;  %s439_s14 = smov 0  }
   0x4 LB: > { %s262_s15 = sadd.s32 4294967295, %s411_s14   ;;  %s28_s16 = sadd.s32 1, %s407_s13  ;;  %s411_s14 = sphi %s439_s14, %s16_s14   ;;  %s407_s13 = sphi %s437_s13, %s540_s13   ;;  %s403_s12 = sphi %s435_s12, %s539_s12   ;;  %s399_s11 = sphi %s433_s11, %s538_s11   ;;  %s395_s10 = sphi %s431_s10, %s537_s10   ;;  %s391_s9 = sphi %s429_s9, %s536_s9  }
   0x5   : > { %p30_p0 = scmp.ge.s32.totalorder %s28_s16, 2  ;;  %s37_s17 = sadd.s32 1, %s399_s11 }
   0x6   : > { %p44_p1 = scmp.ne.s32.totalorder %s399_s11, %s395_s10  ;;  %p45_p2 = scmp.eq.s32.totalorder %s411_s14, 0 }
   0x7   : > { %s542_s16 = smov (%p30_p0, %s28_s16), 0  ;;  %p50_p4 = scmp.ne.s32.totalorder %s395_s10, %s391_s9 }
   0x8   : > { %p465_p3 = por %p45_p2, %p44_p1  ;;  %s32_s19 = ssub.s32 %s407_s13, %s542_s16 }
   0x9   : > { %p51_p5 = scmp.eq.s32.totalorder %s262_s15, 0  ;;  %p35_p6 = scmp.eq.s32.totalorder %s32_s19, 0 }
   0xa   : > { %p281_p8 = scmp.lt.s32.totalorder %s411_s14, 2  ;;  %s116_s22 = sand.u32 1, %s399_s11  }
   0xb   : > { %p472_p7 = por %p51_p5, %p50_p4  ;;  %s273_s23 = sshll.u32 %s407_s13, 3 }
   0xc   : > { %s478_s21 = scalar_select %p35_p6, %s399_s11, %s37_s17  }
   0xd   : > { %s265_s24 = sshll.u32 %s116_s22, 3  ;;  %s127_s27 = scalar_lea.hbm %s531_s0, %s273_s23 }
   0xe   : > { %s129_s28 = sshll.u32 %s127_s27, 4  ;;  %s120_s29 = scalar_lea.vmem [#allocation2], %s265_s24  ;;  %s130_s28 = int_to_ptr.hbm [resolvable:$true] %s129_s28 }
   0xf   : > { %s131_s30 = sshll.u32 %s120_s29, 4  ;;  %p278_p9 = pnand %p281_p8, %p465_p3  ;;  %s132_s30 = int_to_ptr.vmem [resolvable:$true] %s131_s30 }
  0x10   : > { %p268_p10 = scmp.ge.s32.totalorder %s411_s14, 1  ;;  %p136_p11 = scmp.lt.s32.totalorder %s411_s14, 3 }
  0x11   : > { %s117_s3 = scalar_lea.sflag [#allocation3], %s116_s22 }
  0x12   : > { %280 = dma.hbm_to_vmem [thread:$0]  (!%p278_p9), %s130_s28, 128, %s132_s30, %s117_s3  }
  0x13   : > { %p137_p12 = pnand %p268_p10, %p136_p11 }
  0x14   : > { %s142_s4 = sand.u32 (!%p137_p12), 1, %s395_s10  }
  0x15   : > { %140 = sbr.rel (%p137_p12) target bundleno = 173 (0xad), region = 24  ;;  %s269_s5 = sshll.u32 (!%p137_p12), %s142_s4, 3 }
  0x16   : > { %s143_s6 = scalar_lea.sflag (!%p137_p12), [#allocation3], %s142_s4  ;;  %s146_s7 = scalar_lea.vmem (!%p137_p12), [#allocation2], %s269_s5 }
  0x1a   : > { %386 = dma.done.wait (%p472_p7), %s143_s6, 128  }
  0x1b   : > { %388 = vsyncadd (%p472_p7), %s143_s6, 4294967168  ;;  %p164_p13 = scmp.eq.s32.totalorder %s403_s12, 0 }
  0x1c   : > { %vm170_vm0 = vcmask (%p164_p13), 3072   ;;  %v413_v0 = vmov (%p164_p13), 0.0  }
  0x1d   : > { %169 = sbr.rel (!%p164_p13) target bundleno = 34 (0x22), region = 32  ;;  %171 = vst.msk [vmem:[%s532_s1] sm:$0xf] (%p164_p13), %vm170_vm0, %v413_v0 }
  0x1e   : > { %172 = vst.msk [vmem:[%s533_s2] sm:$0xf] (%p164_p13), %vm170_vm0, %v413_v0 }
  0x22 PF: > { %v173_v1 = vld [vmem:[%s146_s7] sm:$0xff]  ;;  %vm181_vm1 = vcmask 1043456   ;;  %vm188_vm2 = vcmask 3072  }
  0x23   : > { %176 = vst [vmem:[#allocation1] ss:$2 sm:$0xff] %v173_v1  ;;  %v191_v2 = vmul.f32 %v173_v1, %v173_v1 }
  0x24   : > { %v174_v13 = vld [vmem:[%s532_s1] sm:$0xf] }
  0x25   : > { %v190_v16 = vld [vmem:[%s533_s2] sm:$0xf] }
  0x2a   : > { %v177_v3 = vld.sshfl [vmem:[#allocation1] sm:$0xff pattern:$0x75316420]  ;;  %v178_v4 = vld.sshfl [vmem:[#allocation1 + $0x8] sm:$0xff pattern:$0x75316420] }
  0x2b   : > { %v182_v5 = vsel %vm181_vm1, %v177_v3, 0.0  ;;  %v183_v6 = vsel %vm181_vm1, %v178_v4, 0.0  ;;  %193 = vst [vmem:[#allocation1] ss:$2 sm:$0xff] %v191_v2 }
  0x2c   : > { %v184_v7 = vadd.f32 %v183_v6, %v182_v5 }
  0x2e   : > { %185 = vadd.xlane.f32.xlu0 %v184_v7 }
  0x32   : > { %v194_v8 = vld.sshfl [vmem:[#allocation1] sm:$0xff pattern:$0x75316420]  ;;  %v195_v9 = vld.sshfl [vmem:[#allocation1 + $0x8] sm:$0xff pattern:$0x75316420] }
  0x33   : > { %v198_v10 = vsel %vm181_vm1, %v194_v8, 0.0  ;;  %v199_v11 = vsel %vm181_vm1, %v195_v9, 0.0 }
  0x34   : > { %v200_v12 = vadd.f32 %v199_v11, %v198_v10 }
  0x36   : > { %201 = vadd.xlane.f32.xlu0 %v200_v12 }
  0xa1   : > { %v186_v14 = vpop.xlane.xlu0 %185 }
  0xa2   : > { %v187_v15 = vadd.f32 %v186_v14, %v174_v13 }
  0xa4   : > { %189 = vst.msk [vmem:[%s532_s1] sm:$0xf] %vm188_vm2, %v187_v15 }
  0xa9   : > { %v202_v17 = vpop.xlane.xlu0 %201 }
  0xaa   : > { %v203_v18 = vadd.f32 %v202_v17, %v190_v16 }
  0xac   : > { %204 = vst.msk [vmem:[%s533_s2] sm:$0xf] %vm188_vm2, %v203_v18 }
  0xad PF: > { %s16_s14 = sadd.s32 1, %s411_s14   ;;  %s536_s9 = smov %s395_s10 }
  0xae   : > { %p13_p0 = scmp.ge.s32.totalorder %s16_s14, 4   ;;  %s537_s10 = smov %s399_s11 }
  0xaf   : > { %s538_s11 = smov %s478_s21  ;;  %s539_s12 = smov %s407_s13 }
  0xb0   : > { %s540_s13 = smov %s542_s16  ;;  %15 = sbr.rel (!%p13_p0) target bundleno = 4 (0x4), region = 72 }
  0xb5   :  { %222 = vsyncpa [#allocation3], 1 }
  0xb6   :  { %224 = vsyncpa [#allocation3 + $0x1], 1 }

</bundles_post_ra>
